<compile_context>
chip_gen: v5e
topology: v5e:2x2
jax: 0.10.0
libtpu: 0.0.40
codegen_flags: <defaults>
</compile_context>

<pallas_src>
import functools

import jax
import jax.numpy as jnp
from jax.experimental import pallas as pl
from jax.experimental.pallas import tpu as pltpu


def _round_up(a, m):
    return ((a + m - 1) // m) * m


def _leaky(v):
    return jnp.where(v > 0, v, 0.2 * v)


def prepare_params(params):
    """One-time parameter prep (hoisted out of the per-call path).

    Packs w3^T / w4^T / w5^T and all five biases (as single-lane columns) into
    one (E/4, 128k) f32 slab => one DMA instead of eight; casts w1^T / w2^T to
    bf16 for the MXU layers.
    """
    E = params["w1"].shape[0]
    d1, d2, d3 = E // 4, E // 8, E // 16
    C = params["w5"].shape[1]
    assert C <= d1, "slab packing requires out_dim <= embed_dim // 4"
    assert d3 >= 1, "embed_dim must be >= 16"

    off_w3 = 0                    # w3^T : rows [0:d3), lanes [off_w3, off_w3+d2)
    off_w4 = off_w3 + d2          # w4^T : rows [0:C),  lanes [off_w4, off_w4+d3)
    off_w5 = off_w4 + d3          # w5^T : rows [0:C),  lanes [off_w5, off_w5+C)
    off_b1 = off_w5 + C           # biases stored as single-lane columns
    off_b2 = off_b1 + 1
    off_b3 = off_b2 + 1
    off_b4 = off_b3 + 1
    off_b5 = off_b4 + 1
    slab_w = _round_up(off_b5 + 1, 128)   # lane-aligned slab width

    slab = jnp.zeros((d1, slab_w), jnp.float32)
    slab = slab.at[0:d3, off_w3:off_w3 + d2].set(params["w3"].T)
    slab = slab.at[0:C, off_w4:off_w4 + d3].set(params["w4"].T)
    slab = slab.at[0:C, off_w5:off_w5 + C].set(params["w5"].T)
    slab = slab.at[0:d1, off_b1].set(params["b1"].reshape(-1))
    slab = slab.at[0:d2, off_b2].set(params["b2"].reshape(-1))
    slab = slab.at[0:d3, off_b3].set(params["b3"].reshape(-1))
    slab = slab.at[0:C, off_b4].set(params["b4"].reshape(-1))
    slab = slab.at[0:C, off_b5].set(params["b5"].reshape(-1))

    prepared = dict(
        w1t=params["w1"].T.astype(jnp.bfloat16),   # (d1, E)
        w2t=params["w2"].T.astype(jnp.bfloat16),   # (d2, d1)
        slab=slab,                                 # (d1, slab_w) f32
    )
    offsets = dict(w3=off_w3, w4=off_w4, w5=off_w5, b1=off_b1, b2=off_b2,
                   b3=off_b3, b4=off_b4, b5=off_b5)
    dims = dict(E=E, d1=d1, d2=d2, d3=d3, C=C, slab_w=slab_w)
    return prepared, offsets, dims


def disclf_gender_forward(x, labels, prepared, *, offsets, dims, max_tile=1024):
    """Returns (loss, probs) for the DisClfGender forward pass."""
    N, E = x.shape
    assert E == dims["E"]
    d1, d2, d3, C = dims["d1"], dims["d2"], dims["d3"], dims["C"]
    slab_w = dims["slab_w"]
    off = offsets

    # ---- tile selection: no padding for tiny batches; >=2 tiles when big ----
    if N <= 128:
        tile_n = N                                    # single full-array tile
    else:
        tile_n = min(max_tile, _round_up(pl.cdiv(N, 2), 128))
    num_tiles = pl.cdiv(N, tile_n)
    n_pad = num_tiles * tile_n

    lab_in = labels.astype(jnp.int32)
    if n_pad != N:                                    # pad only when needed
        x_in = jnp.pad(x, ((0, n_pad - N), (0, 0)))
        lab_in = jnp.pad(lab_in, (0, n_pad - N))
    else:
        x_in = x
    lab_in = lab_in.reshape(1, n_pad)

    def kernel(x_ref, lab_ref, w1t_ref, w2t_ref, slab_ref, probs_ref, perex_ref):
        # ---- MXU layers (bf16 in, f32 accumulate), feature-major outputs ----
        # Cast x -> bf16 in-kernel (avoids a wrapper-side HBM rewrite of x).
        xb = x_ref[...].astype(jnp.bfloat16)
        # h1 = w1^T @ x^T : contract last dims of both operands -> (d1, T)
        h = jax.lax.dot_general(
            w1t_ref[...], xb,
            dimension_numbers=(((1,), (1,)), ((), ())),
            preferred_element_type=jnp.float32)
        h = _leaky(h + slab_ref[0:d1, off["b1"]:off["b1"] + 1])
        # h2 = w2^T @ h1 -> (d2, T)
        h = jnp.dot(w2t_ref[...], h.astype(jnp.bfloat16),
                    preferred_element_type=jnp.float32)
        h = _leaky(h + slab_ref[0:d2, off["b2"]:off["b2"] + 1])

        # ---- tail layers: VPU outer-product when tiny, MXU fallback else ----
        def tail_layer(hin, k_dim, j_dim, w_off, b_off, activate):
            if k_dim <= 32:
                acc = jnp.zeros((j_dim, tile_n), jnp.float32)
                for k in range(k_dim):                               # tiny, unrolled
                    col = slab_ref[0:j_dim, w_off + k:w_off + k + 1]  # (j, 1) vld
                    acc = acc + col * hin[k:k + 1, :]                # outer product
            else:
                wt = slab_ref[0:j_dim, w_off:w_off + k_dim]          # (j, k) f32
                acc = jnp.dot(wt, hin, preferred_element_type=jnp.float32)
            acc = acc + slab_ref[0:j_dim, b_off:b_off + 1]
            return _leaky(acc) if activate else acc

        h = tail_layer(h, d2, d3, off["w3"], off["b3"], True)   # E/8  -> E/16
        h = tail_layer(h, d3, C, off["w4"], off["b4"], True)    # E/16 -> out
        s = tail_layer(h, C, C, off["w5"], off["b5"], False)    # out  -> out (C, T)

        # ---- softmax over classes (sublane axis); batch is lane-dense ----
        m = jnp.max(s, axis=0, keepdims=True)
        e = jnp.exp(s - m)
        probs = e * pl.reciprocal(jnp.sum(e, axis=0, keepdims=True), approx=True)
        probs_ref[...] = probs

        # ---- CrossEntropyLoss applied to the softmax outputs (as in torch) ---
        lab = lab_ref[...]                                           # (1, T) int32
        cls = jax.lax.broadcasted_iota(jnp.int32, (C, tile_n), 0)
        onehot = (cls == lab).astype(jnp.float32)
        # probs in [0,1] -> exp cannot overflow; no max subtraction needed.
        lse = jnp.log(jnp.sum(jnp.exp(probs), axis=0, keepdims=True))
        picked = jnp.sum(probs * onehot, axis=0, keepdims=True)
        gcol = (pl.program_id(0) * tile_n
                + jax.lax.broadcasted_iota(jnp.int32, (1, tile_n), 1))
        valid = (gcol < N).astype(jnp.float32)                       # mask pad rows
        perex_ref[...] = (lse - picked) * valid                      # (1, T) store

    probs_t, per_ex = pl.pallas_call(
        kernel,
        grid=(num_tiles,),
        in_specs=[
            pl.BlockSpec((tile_n, E), lambda i: (i, 0)),       # x (f32, row-major)
            pl.BlockSpec((1, tile_n), lambda i: (0, i)),       # labels (lane-major)
            pl.BlockSpec((d1, E), lambda i: (0, 0)),           # w1^T (bf16, resident)
            pl.BlockSpec((d2, d1), lambda i: (0, 0)),          # w2^T (bf16, resident)
            pl.BlockSpec((d1, slab_w), lambda i: (0, 0)),      # packed small params
        ],
        out_specs=(
            pl.BlockSpec((C, tile_n), lambda i: (0, i)),       # probs^T (lane-dense)
            pl.BlockSpec((1, tile_n), lambda i: (0, i)),       # per-example CE
        ),
        out_shape=(
            jax.ShapeDtypeStruct((C, n_pad), jnp.float32),
            jax.ShapeDtypeStruct((1, n_pad), jnp.float32),
        ),
        compiler_params=pltpu.CompilerParams(
            dimension_semantics=("parallel",)),
    )(x_in, lab_in, prepared["w1t"], prepared["w2t"], prepared["slab"])

    probs = probs_t[:, :N].T                       # (N, C), tiny wrapper op
    loss = jnp.sum(per_ex) * (1.0 / N)             # mean reduction
    return loss, probs


def init_params(key, embed_dim, out_dim):
    dims = [embed_dim, embed_dim // 4, embed_dim // 8, embed_dim // 16,
            out_dim, out_dim]
    params = {}
    for i in range(5):
        key, kw, kb = jax.random.split(key, 3)
        fan_in = dims[i]
        bound = 1.0 / (fan_in ** 0.5)
        params[f"w{i+1}"] = jax.random.uniform(kw, (dims[i], dims[i + 1]),
                                               jnp.float32, -bound, bound)
        params[f"b{i+1}"] = jax.random.uniform(kb, (1, dims[i + 1]),
                                               jnp.float32, -bound, bound)
    return params


def _reference(x, labels, params):
    # Mirrors the kernel's precision policy (bf16 inputs to the two MXU layers,
    # f32 for the tiny tail layers).
    w1b = params["w1"].astype(jnp.bfloat16)
    w2b = params["w2"].astype(jnp.bfloat16)
    h = jnp.dot(x.astype(jnp.bfloat16), w1b,
                preferred_element_type=jnp.float32) + params["b1"]
    h = jnp.where(h > 0, h, 0.2 * h)
    h = jnp.dot(h.astype(jnp.bfloat16), w2b,
                preferred_element_type=jnp.float32) + params["b2"]
    h = jnp.where(h > 0, h, 0.2 * h)
    for i in (3, 4):
        h = h @ params[f"w{i}"] + params[f"b{i}"]
        h = jnp.where(h > 0, h, 0.2 * h)
    scores = h @ params["w5"] + params["b5"]
    probs = jax.nn.softmax(scores, axis=1)
    logp = jax.nn.log_softmax(probs, axis=1)   # CE applied to the softmax outputs
    loss = -jnp.mean(logp[jnp.arange(x.shape[0]), labels])
    return loss, probs


if __name__ == "__main__":
    embed_dim, out_dim, batch = 128, 2, 8

    key = jax.random.PRNGKey(0)
    k_x, k_lab, k_p = jax.random.split(key, 3)

    x = jax.random.normal(k_x, (batch, embed_dim), dtype=jnp.float32)
    labels = jax.random.randint(k_lab, (batch,), 0, out_dim, dtype=jnp.int32)
    params = init_params(k_p, embed_dim, out_dim)

    # Parameter prep is hoisted: done once per parameter set, not per call.
    prepared, offsets, dims = prepare_params(params)
    fwd = jax.jit(functools.partial(disclf_gender_forward,
                                    offsets=offsets, dims=dims))

    loss, probs = fwd(x, labels, prepared)
    jax.block_until_ready((loss, probs))

    ref_loss, ref_probs = _reference(x, labels, params)
    # Tolerance covers bf16 MXU inputs + approx reciprocal in the softmax.
    assert jnp.allclose(loss, ref_loss, atol=5e-3, rtol=5e-3), (loss, ref_loss)
    assert jnp.allclose(probs, ref_probs, atol=5e-3, rtol=5e-3)

    print("KERNEL_OK")
</pallas_src>

<mosaic_0001>
module attributes {stable_mosaic.version = 11 : i64} {
  func.func @kernel(%arg0: i32, %arg1: memref<8x128xf32, #tpu.memory_space<vmem>>, %arg2: memref<1x8xi32, #tpu.memory_space<vmem>>, %arg3: memref<32x128xbf16, #tpu.memory_space<vmem>>, %arg4: memref<16x32xbf16, #tpu.memory_space<vmem>>, %arg5: memref<32x128xf32, #tpu.memory_space<vmem>>, %arg6: memref<2x8xf32, #tpu.memory_space<vmem>>, %arg7: memref<1x8xf32, #tpu.memory_space<vmem>>) attributes {dimension_semantics = [#tpu.dimension_semantics<parallel>], iteration_bounds = array<i64: 1>, scalar_prefetch = 0 : i64, scratch_operands = 0 : i64, tpu.core_type = #tpu.core_type<tc>, window_params = [{transform_indices = @transform_0, window_bounds = array<i64: 8, 128>}, {transform_indices = @transform_1, window_bounds = array<i64: 1, 8>}, {pipeline_mode = #tpu.pipeline_mode<synchronous>, transform_indices = @transform_2, window_bounds = array<i64: 32, 128>}, {pipeline_mode = #tpu.pipeline_mode<synchronous>, transform_indices = @transform_3, window_bounds = array<i64: 16, 32>}, {pipeline_mode = #tpu.pipeline_mode<synchronous>, transform_indices = @transform_4, window_bounds = array<i64: 32, 128>}, {transform_indices = @transform_5, window_bounds = array<i64: 2, 8>}, {transform_indices = @transform_6, window_bounds = array<i64: 1, 8>}]} {
    %c0 = arith.constant 0 : index
    %c0_0 = arith.constant 0 : index
    %0 = vector.load %arg1[%c0, %c0_0] : memref<8x128xf32, #tpu.memory_space<vmem>>, vector<8x128xf32>
    %1 = arith.truncf %0 : vector<8x128xf32> to vector<8x128xbf16>
    %c0_1 = arith.constant 0 : index
    %c0_2 = arith.constant 0 : index
    %2 = vector.load %arg3[%c0_1, %c0_2] : memref<32x128xbf16, #tpu.memory_space<vmem>>, vector<32x128xbf16>
    %cst = arith.constant dense<0.000000e+00> : vector<32x8xf32>
    %3 = tpu.matmul %2, %1, %cst {dimension_numbers = #tpu.dot_dimension_numbers<[1], [1], [0], [0], [0, 0, 1, 0], [], []>} : vector<32x128xbf16>, vector<8x128xbf16>, vector<32x8xf32> -> vector<32x8xf32>
    %c0_3 = arith.constant 0 : index
    %c26 = arith.constant 26 : index
    %4 = vector.load %arg5[%c0_3, %c26] : memref<32x128xf32, #tpu.memory_space<vmem>>, vector<32x1xf32>
    %5 = vector.broadcast %4 : vector<32x1xf32> to vector<32x8xf32>
    %6 = arith.addf %3, %5 : vector<32x8xf32>
    %cst_4 = arith.constant 0.000000e+00 : f32
    %7 = vector.broadcast %cst_4 : f32 to vector<32x8xf32>
    %8 = arith.cmpf ogt, %6, %7 : vector<32x8xf32>
    %cst_5 = arith.constant 2.000000e-01 : f32
    %9 = vector.broadcast %cst_5 : f32 to vector<32x8xf32>
    %10 = arith.mulf %9, %6 : vector<32x8xf32>
    %11 = arith.select %8, %6, %10 : vector<32x8xi1>, vector<32x8xf32>
    %c0_6 = arith.constant 0 : index
    %c0_7 = arith.constant 0 : index
    %12 = vector.load %arg4[%c0_6, %c0_7] : memref<16x32xbf16, #tpu.memory_space<vmem>>, vector<16x32xbf16>
    %13 = arith.truncf %11 : vector<32x8xf32> to vector<32x8xbf16>
    %cst_8 = arith.constant dense<0.000000e+00> : vector<16x8xf32>
    %14 = tpu.matmul %12, %13, %cst_8 {dimension_numbers = #tpu.dot_dimension_numbers<[1], [0], [0], [1], [0, 0, 1, 1], [], []>} : vector<16x32xbf16>, vector<32x8xbf16>, vector<16x8xf32> -> vector<16x8xf32>
    %c0_9 = arith.constant 0 : index
    %c27 = arith.constant 27 : index
    %15 = vector.load %arg5[%c0_9, %c27] : memref<32x128xf32, #tpu.memory_space<vmem>>, vector<16x1xf32>
    %16 = vector.broadcast %15 : vector<16x1xf32> to vector<16x8xf32>
    %17 = arith.addf %14, %16 : vector<16x8xf32>
    %cst_10 = arith.constant 0.000000e+00 : f32
    %18 = vector.broadcast %cst_10 : f32 to vector<16x8xf32>
    %19 = arith.cmpf ogt, %17, %18 : vector<16x8xf32>
    %cst_11 = arith.constant 2.000000e-01 : f32
    %20 = vector.broadcast %cst_11 : f32 to vector<16x8xf32>
    %21 = arith.mulf %20, %17 : vector<16x8xf32>
    %22 = arith.select %19, %17, %21 : vector<16x8xi1>, vector<16x8xf32>
    %cst_12 = arith.constant 0.000000e+00 : f32
    %23 = vector.broadcast %cst_12 : f32 to vector<8x8xf32>
    %c0_13 = arith.constant 0 : index
    %c0_14 = arith.constant 0 : index
    %24 = vector.load %arg5[%c0_13, %c0_14] : memref<32x128xf32, #tpu.memory_space<vmem>>, vector<8x1xf32>
    %25 = vector.extract_strided_slice %22 {offsets = [0, 0], sizes = [1, 8], strides = [1, 1]} : vector<16x8xf32> to vector<1x8xf32>
    %26 = vector.broadcast %24 : vector<8x1xf32> to vector<8x8xf32>
    %27 = vector.broadcast %25 : vector<1x8xf32> to vector<8x8xf32>
    %28 = arith.mulf %26, %27 : vector<8x8xf32>
    %29 = arith.addf %23, %28 : vector<8x8xf32>
    %c0_15 = arith.constant 0 : index
    %c1 = arith.constant 1 : index
    %30 = vector.load %arg5[%c0_15, %c1] : memref<32x128xf32, #tpu.memory_space<vmem>>, vector<8x1xf32>
    %31 = vector.extract_strided_slice %22 {offsets = [1, 0], sizes = [1, 8], strides = [1, 1]} : vector<16x8xf32> to vector<1x8xf32>
    %32 = vector.broadcast %30 : vector<8x1xf32> to vector<8x8xf32>
    %33 = vector.broadcast %31 : vector<1x8xf32> to vector<8x8xf32>
    %34 = arith.mulf %32, %33 : vector<8x8xf32>
    %35 = arith.addf %29, %34 : vector<8x8xf32>
    %c0_16 = arith.constant 0 : index
    %c2 = arith.constant 2 : index
    %36 = vector.load %arg5[%c0_16, %c2] : memref<32x128xf32, #tpu.memory_space<vmem>>, vector<8x1xf32>
    %37 = vector.extract_strided_slice %22 {offsets = [2, 0], sizes = [1, 8], strides = [1, 1]} : vector<16x8xf32> to vector<1x8xf32>
    %38 = vector.broadcast %36 : vector<8x1xf32> to vector<8x8xf32>
    %39 = vector.broadcast %37 : vector<1x8xf32> to vector<8x8xf32>
    %40 = arith.mulf %38, %39 : vector<8x8xf32>
    %41 = arith.addf %35, %40 : vector<8x8xf32>
    %c0_17 = arith.constant 0 : index
    %c3 = arith.constant 3 : index
    %42 = vector.load %arg5[%c0_17, %c3] : memref<32x128xf32, #tpu.memory_space<vmem>>, vector<8x1xf32>
    %43 = vector.extract_strided_slice %22 {offsets = [3, 0], sizes = [1, 8], strides = [1, 1]} : vector<16x8xf32> to vector<1x8xf32>
    %44 = vector.broadcast %42 : vector<8x1xf32> to vector<8x8xf32>
    %45 = vector.broadcast %43 : vector<1x8xf32> to vector<8x8xf32>
    %46 = arith.mulf %44, %45 : vector<8x8xf32>
    %47 = arith.addf %41, %46 : vector<8x8xf32>
    %c0_18 = arith.constant 0 : index
    %c4 = arith.constant 4 : index
    %48 = vector.load %arg5[%c0_18, %c4] : memref<32x128xf32, #tpu.memory_space<vmem>>, vector<8x1xf32>
    %49 = vector.extract_strided_slice %22 {offsets = [4, 0], sizes = [1, 8], strides = [1, 1]} : vector<16x8xf32> to vector<1x8xf32>
    %50 = vector.broadcast %48 : vector<8x1xf32> to vector<8x8xf32>
    %51 = vector.broadcast %49 : vector<1x8xf32> to vector<8x8xf32>
    %52 = arith.mulf %50, %51 : vector<8x8xf32>
    %53 = arith.addf %47, %52 : vector<8x8xf32>
    %c0_19 = arith.constant 0 : index
    %c5 = arith.constant 5 : index
    %54 = vector.load %arg5[%c0_19, %c5] : memref<32x128xf32, #tpu.memory_space<vmem>>, vector<8x1xf32>
    %55 = vector.extract_strided_slice %22 {offsets = [5, 0], sizes = [1, 8], strides = [1, 1]} : vector<16x8xf32> to vector<1x8xf32>
    %56 = vector.broadcast %54 : vector<8x1xf32> to vector<8x8xf32>
    %57 = vector.broadcast %55 : vector<1x8xf32> to vector<8x8xf32>
    %58 = arith.mulf %56, %57 : vector<8x8xf32>
    %59 = arith.addf %53, %58 : vector<8x8xf32>
    %c0_20 = arith.constant 0 : index
    %c6 = arith.constant 6 : index
    %60 = vector.load %arg5[%c0_20, %c6] : memref<32x128xf32, #tpu.memory_space<vmem>>, vector<8x1xf32>
    %61 = vector.extract_strided_slice %22 {offsets = [6, 0], sizes = [1, 8], strides = [1, 1]} : vector<16x8xf32> to vector<1x8xf32>
    %62 = vector.broadcast %60 : vector<8x1xf32> to vector<8x8xf32>
    %63 = vector.broadcast %61 : vector<1x8xf32> to vector<8x8xf32>
    %64 = arith.mulf %62, %63 : vector<8x8xf32>
    %65 = arith.addf %59, %64 : vector<8x8xf32>
    %c0_21 = arith.constant 0 : index
    %c7 = arith.constant 7 : index
    %66 = vector.load %arg5[%c0_21, %c7] : memref<32x128xf32, #tpu.memory_space<vmem>>, vector<8x1xf32>
    %67 = vector.extract_strided_slice %22 {offsets = [7, 0], sizes = [1, 8], strides = [1, 1]} : vector<16x8xf32> to vector<1x8xf32>
    %68 = vector.broadcast %66 : vector<8x1xf32> to vector<8x8xf32>
    %69 = vector.broadcast %67 : vector<1x8xf32> to vector<8x8xf32>
    %70 = arith.mulf %68, %69 : vector<8x8xf32>
    %71 = arith.addf %65, %70 : vector<8x8xf32>
    %c0_22 = arith.constant 0 : index
    %c8 = arith.constant 8 : index
    %72 = vector.load %arg5[%c0_22, %c8] : memref<32x128xf32, #tpu.memory_space<vmem>>, vector<8x1xf32>
    %73 = vector.extract_strided_slice %22 {offsets = [8, 0], sizes = [1, 8], strides = [1, 1]} : vector<16x8xf32> to vector<1x8xf32>
    %74 = vector.broadcast %72 : vector<8x1xf32> to vector<8x8xf32>
    %75 = vector.broadcast %73 : vector<1x8xf32> to vector<8x8xf32>
    %76 = arith.mulf %74, %75 : vector<8x8xf32>
    %77 = arith.addf %71, %76 : vector<8x8xf32>
    %c0_23 = arith.constant 0 : index
    %c9 = arith.constant 9 : index
    %78 = vector.load %arg5[%c0_23, %c9] : memref<32x128xf32, #tpu.memory_space<vmem>>, vector<8x1xf32>
    %79 = vector.extract_strided_slice %22 {offsets = [9, 0], sizes = [1, 8], strides = [1, 1]} : vector<16x8xf32> to vector<1x8xf32>
    %80 = vector.broadcast %78 : vector<8x1xf32> to vector<8x8xf32>
    %81 = vector.broadcast %79 : vector<1x8xf32> to vector<8x8xf32>
    %82 = arith.mulf %80, %81 : vector<8x8xf32>
    %83 = arith.addf %77, %82 : vector<8x8xf32>
    %c0_24 = arith.constant 0 : index
    %c10 = arith.constant 10 : index
    %84 = vector.load %arg5[%c0_24, %c10] : memref<32x128xf32, #tpu.memory_space<vmem>>, vector<8x1xf32>
    %85 = vector.extract_strided_slice %22 {offsets = [10, 0], sizes = [1, 8], strides = [1, 1]} : vector<16x8xf32> to vector<1x8xf32>
    %86 = vector.broadcast %84 : vector<8x1xf32> to vector<8x8xf32>
    %87 = vector.broadcast %85 : vector<1x8xf32> to vector<8x8xf32>
    %88 = arith.mulf %86, %87 : vector<8x8xf32>
    %89 = arith.addf %83, %88 : vector<8x8xf32>
    %c0_25 = arith.constant 0 : index
    %c11 = arith.constant 11 : index
    %90 = vector.load %arg5[%c0_25, %c11] : memref<32x128xf32, #tpu.memory_space<vmem>>, vector<8x1xf32>
    %91 = vector.extract_strided_slice %22 {offsets = [11, 0], sizes = [1, 8], strides = [1, 1]} : vector<16x8xf32> to vector<1x8xf32>
    %92 = vector.broadcast %90 : vector<8x1xf32> to vector<8x8xf32>
    %93 = vector.broadcast %91 : vector<1x8xf32> to vector<8x8xf32>
    %94 = arith.mulf %92, %93 : vector<8x8xf32>
    %95 = arith.addf %89, %94 : vector<8x8xf32>
    %c0_26 = arith.constant 0 : index
    %c12 = arith.constant 12 : index
    %96 = vector.load %arg5[%c0_26, %c12] : memref<32x128xf32, #tpu.memory_space<vmem>>, vector<8x1xf32>
    %97 = vector.extract_strided_slice %22 {offsets = [12, 0], sizes = [1, 8], strides = [1, 1]} : vector<16x8xf32> to vector<1x8xf32>
    %98 = vector.broadcast %96 : vector<8x1xf32> to vector<8x8xf32>
    %99 = vector.broadcast %97 : vector<1x8xf32> to vector<8x8xf32>
    %100 = arith.mulf %98, %99 : vector<8x8xf32>
    %101 = arith.addf %95, %100 : vector<8x8xf32>
    %c0_27 = arith.constant 0 : index
    %c13 = arith.constant 13 : index
    %102 = vector.load %arg5[%c0_27, %c13] : memref<32x128xf32, #tpu.memory_space<vmem>>, vector<8x1xf32>
    %103 = vector.extract_strided_slice %22 {offsets = [13, 0], sizes = [1, 8], strides = [1, 1]} : vector<16x8xf32> to vector<1x8xf32>
    %104 = vector.broadcast %102 : vector<8x1xf32> to vector<8x8xf32>
    %105 = vector.broadcast %103 : vector<1x8xf32> to vector<8x8xf32>
    %106 = arith.mulf %104, %105 : vector<8x8xf32>
    %107 = arith.addf %101, %106 : vector<8x8xf32>
    %c0_28 = arith.constant 0 : index
    %c14 = arith.constant 14 : index
    %108 = vector.load %arg5[%c0_28, %c14] : memref<32x128xf32, #tpu.memory_space<vmem>>, vector<8x1xf32>
    %109 = vector.extract_strided_slice %22 {offsets = [14, 0], sizes = [1, 8], strides = [1, 1]} : vector<16x8xf32> to vector<1x8xf32>
    %110 = vector.broadcast %108 : vector<8x1xf32> to vector<8x8xf32>
    %111 = vector.broadcast %109 : vector<1x8xf32> to vector<8x8xf32>
    %112 = arith.mulf %110, %111 : vector<8x8xf32>
    %113 = arith.addf %107, %112 : vector<8x8xf32>
    %c0_29 = arith.constant 0 : index
    %c15 = arith.constant 15 : index
    %114 = vector.load %arg5[%c0_29, %c15] : memref<32x128xf32, #tpu.memory_space<vmem>>, vector<8x1xf32>
    %115 = vector.extract_strided_slice %22 {offsets = [15, 0], sizes = [1, 8], strides = [1, 1]} : vector<16x8xf32> to vector<1x8xf32>
    %116 = vector.broadcast %114 : vector<8x1xf32> to vector<8x8xf32>
    %117 = vector.broadcast %115 : vector<1x8xf32> to vector<8x8xf32>
    %118 = arith.mulf %116, %117 : vector<8x8xf32>
    %119 = arith.addf %113, %118 : vector<8x8xf32>
    %c0_30 = arith.constant 0 : index
    %c28 = arith.constant 28 : index
    %120 = vector.load %arg5[%c0_30, %c28] : memref<32x128xf32, #tpu.memory_space<vmem>>, vector<8x1xf32>
    %121 = vector.broadcast %120 : vector<8x1xf32> to vector<8x8xf32>
    %122 = arith.addf %119, %121 : vector<8x8xf32>
    %cst_31 = arith.constant 0.000000e+00 : f32
    %123 = vector.broadcast %cst_31 : f32 to vector<8x8xf32>
    %124 = arith.cmpf ogt, %122, %123 : vector<8x8xf32>
    %cst_32 = arith.constant 2.000000e-01 : f32
    %125 = vector.broadcast %cst_32 : f32 to vector<8x8xf32>
    %126 = arith.mulf %125, %122 : vector<8x8xf32>
    %127 = arith.select %124, %122, %126 : vector<8x8xi1>, vector<8x8xf32>
    %cst_33 = arith.constant 0.000000e+00 : f32
    %128 = vector.broadcast %cst_33 : f32 to vector<2x8xf32>
    %c0_34 = arith.constant 0 : index
    %c16 = arith.constant 16 : index
    %129 = vector.load %arg5[%c0_34, %c16] : memref<32x128xf32, #tpu.memory_space<vmem>>, vector<2x1xf32>
    %130 = vector.extract_strided_slice %127 {offsets = [0, 0], sizes = [1, 8], strides = [1, 1]} : vector<8x8xf32> to vector<1x8xf32>
    %131 = vector.broadcast %129 : vector<2x1xf32> to vector<2x8xf32>
    %132 = vector.broadcast %130 : vector<1x8xf32> to vector<2x8xf32>
    %133 = arith.mulf %131, %132 : vector<2x8xf32>
    %134 = arith.addf %128, %133 : vector<2x8xf32>
    %c0_35 = arith.constant 0 : index
    %c17 = arith.constant 17 : index
    %135 = vector.load %arg5[%c0_35, %c17] : memref<32x128xf32, #tpu.memory_space<vmem>>, vector<2x1xf32>
    %136 = vector.extract_strided_slice %127 {offsets = [1, 0], sizes = [1, 8], strides = [1, 1]} : vector<8x8xf32> to vector<1x8xf32>
    %137 = vector.broadcast %135 : vector<2x1xf32> to vector<2x8xf32>
    %138 = vector.broadcast %136 : vector<1x8xf32> to vector<2x8xf32>
    %139 = arith.mulf %137, %138 : vector<2x8xf32>
    %140 = arith.addf %134, %139 : vector<2x8xf32>
    %c0_36 = arith.constant 0 : index
    %c18 = arith.constant 18 : index
    %141 = vector.load %arg5[%c0_36, %c18] : memref<32x128xf32, #tpu.memory_space<vmem>>, vector<2x1xf32>
    %142 = vector.extract_strided_slice %127 {offsets = [2, 0], sizes = [1, 8], strides = [1, 1]} : vector<8x8xf32> to vector<1x8xf32>
    %143 = vector.broadcast %141 : vector<2x1xf32> to vector<2x8xf32>
    %144 = vector.broadcast %142 : vector<1x8xf32> to vector<2x8xf32>
    %145 = arith.mulf %143, %144 : vector<2x8xf32>
    %146 = arith.addf %140, %145 : vector<2x8xf32>
    %c0_37 = arith.constant 0 : index
    %c19 = arith.constant 19 : index
    %147 = vector.load %arg5[%c0_37, %c19] : memref<32x128xf32, #tpu.memory_space<vmem>>, vector<2x1xf32>
    %148 = vector.extract_strided_slice %127 {offsets = [3, 0], sizes = [1, 8], strides = [1, 1]} : vector<8x8xf32> to vector<1x8xf32>
    %149 = vector.broadcast %147 : vector<2x1xf32> to vector<2x8xf32>
    %150 = vector.broadcast %148 : vector<1x8xf32> to vector<2x8xf32>
    %151 = arith.mulf %149, %150 : vector<2x8xf32>
    %152 = arith.addf %146, %151 : vector<2x8xf32>
    %c0_38 = arith.constant 0 : index
    %c20 = arith.constant 20 : index
    %153 = vector.load %arg5[%c0_38, %c20] : memref<32x128xf32, #tpu.memory_space<vmem>>, vector<2x1xf32>
    %154 = vector.extract_strided_slice %127 {offsets = [4, 0], sizes = [1, 8], strides = [1, 1]} : vector<8x8xf32> to vector<1x8xf32>
    %155 = vector.broadcast %153 : vector<2x1xf32> to vector<2x8xf32>
    %156 = vector.broadcast %154 : vector<1x8xf32> to vector<2x8xf32>
    %157 = arith.mulf %155, %156 : vector<2x8xf32>
    %158 = arith.addf %152, %157 : vector<2x8xf32>
    %c0_39 = arith.constant 0 : index
    %c21 = arith.constant 21 : index
    %159 = vector.load %arg5[%c0_39, %c21] : memref<32x128xf32, #tpu.memory_space<vmem>>, vector<2x1xf32>
    %160 = vector.extract_strided_slice %127 {offsets = [5, 0], sizes = [1, 8], strides = [1, 1]} : vector<8x8xf32> to vector<1x8xf32>
    %161 = vector.broadcast %159 : vector<2x1xf32> to vector<2x8xf32>
    %162 = vector.broadcast %160 : vector<1x8xf32> to vector<2x8xf32>
    %163 = arith.mulf %161, %162 : vector<2x8xf32>
    %164 = arith.addf %158, %163 : vector<2x8xf32>
    %c0_40 = arith.constant 0 : index
    %c22 = arith.constant 22 : index
    %165 = vector.load %arg5[%c0_40, %c22] : memref<32x128xf32, #tpu.memory_space<vmem>>, vector<2x1xf32>
    %166 = vector.extract_strided_slice %127 {offsets = [6, 0], sizes = [1, 8], strides = [1, 1]} : vector<8x8xf32> to vector<1x8xf32>
    %167 = vector.broadcast %165 : vector<2x1xf32> to vector<2x8xf32>
    %168 = vector.broadcast %166 : vector<1x8xf32> to vector<2x8xf32>
    %169 = arith.mulf %167, %168 : vector<2x8xf32>
    %170 = arith.addf %164, %169 : vector<2x8xf32>
    %c0_41 = arith.constant 0 : index
    %c23 = arith.constant 23 : index
    %171 = vector.load %arg5[%c0_41, %c23] : memref<32x128xf32, #tpu.memory_space<vmem>>, vector<2x1xf32>
    %172 = vector.extract_strided_slice %127 {offsets = [7, 0], sizes = [1, 8], strides = [1, 1]} : vector<8x8xf32> to vector<1x8xf32>
    %173 = vector.broadcast %171 : vector<2x1xf32> to vector<2x8xf32>
    %174 = vector.broadcast %172 : vector<1x8xf32> to vector<2x8xf32>
    %175 = arith.mulf %173, %174 : vector<2x8xf32>
    %176 = arith.addf %170, %175 : vector<2x8xf32>
    %c0_42 = arith.constant 0 : index
    %c29 = arith.constant 29 : index
    %177 = vector.load %arg5[%c0_42, %c29] : memref<32x128xf32, #tpu.memory_space<vmem>>, vector<2x1xf32>
    %178 = vector.broadcast %177 : vector<2x1xf32> to vector<2x8xf32>
    %179 = arith.addf %176, %178 : vector<2x8xf32>
    %cst_43 = arith.constant 0.000000e+00 : f32
    %180 = vector.broadcast %cst_43 : f32 to vector<2x8xf32>
    %181 = arith.cmpf ogt, %179, %180 : vector<2x8xf32>
    %cst_44 = arith.constant 2.000000e-01 : f32
    %182 = vector.broadcast %cst_44 : f32 to vector<2x8xf32>
    %183 = arith.mulf %182, %179 : vector<2x8xf32>
    %184 = arith.select %181, %179, %183 : vector<2x8xi1>, vector<2x8xf32>
    %cst_45 = arith.constant 0.000000e+00 : f32
    %185 = vector.broadcast %cst_45 : f32 to vector<2x8xf32>
    %c0_46 = arith.constant 0 : index
    %c24 = arith.constant 24 : index
    %186 = vector.load %arg5[%c0_46, %c24] : memref<32x128xf32, #tpu.memory_space<vmem>>, vector<2x1xf32>
    %187 = vector.extract_strided_slice %184 {offsets = [0, 0], sizes = [1, 8], strides = [1, 1]} : vector<2x8xf32> to vector<1x8xf32>
    %188 = vector.broadcast %186 : vector<2x1xf32> to vector<2x8xf32>
    %189 = vector.broadcast %187 : vector<1x8xf32> to vector<2x8xf32>
    %190 = arith.mulf %188, %189 : vector<2x8xf32>
    %191 = arith.addf %185, %190 : vector<2x8xf32>
    %c0_47 = arith.constant 0 : index
    %c25 = arith.constant 25 : index
    %192 = vector.load %arg5[%c0_47, %c25] : memref<32x128xf32, #tpu.memory_space<vmem>>, vector<2x1xf32>
    %193 = vector.extract_strided_slice %184 {offsets = [1, 0], sizes = [1, 8], strides = [1, 1]} : vector<2x8xf32> to vector<1x8xf32>
    %194 = vector.broadcast %192 : vector<2x1xf32> to vector<2x8xf32>
    %195 = vector.broadcast %193 : vector<1x8xf32> to vector<2x8xf32>
    %196 = arith.mulf %194, %195 : vector<2x8xf32>
    %197 = arith.addf %191, %196 : vector<2x8xf32>
    %c0_48 = arith.constant 0 : index
    %c30 = arith.constant 30 : index
    %198 = vector.load %arg5[%c0_48, %c30] : memref<32x128xf32, #tpu.memory_space<vmem>>, vector<2x1xf32>
    %199 = vector.broadcast %198 : vector<2x1xf32> to vector<2x8xf32>
    %200 = arith.addf %197, %199 : vector<2x8xf32>
    %cst_49 = arith.constant dense<0xFF800000> : vector<8xf32>
    %201 = vector.multi_reduction <maximumf>, %200, %cst_49 [0] : vector<2x8xf32> to vector<8xf32>
    %202 = vector.shape_cast %201 : vector<8xf32> to vector<1x8xf32>
    %203 = vector.broadcast %202 : vector<1x8xf32> to vector<2x8xf32>
    %204 = arith.subf %200, %203 : vector<2x8xf32>
    %205 = math.exp %204 : vector<2x8xf32>
    %cst_50 = arith.constant dense<0.000000e+00> : vector<8xf32>
    %206 = vector.multi_reduction <add>, %205, %cst_50 [0] : vector<2x8xf32> to vector<8xf32>
    %207 = vector.shape_cast %206 : vector<8xf32> to vector<1x8xf32>
    %208 = tpu.reciprocal %207 {approx = true} : vector<1x8xf32> -> vector<1x8xf32>
    %209 = vector.broadcast %208 : vector<1x8xf32> to vector<2x8xf32>
    %210 = arith.mulf %205, %209 : vector<2x8xf32>
    %c0_51 = arith.constant 0 : index
    %c0_52 = arith.constant 0 : index
    %211 = vector.load %arg6[%c0_51, %c0_52] : memref<2x8xf32, #tpu.memory_space<vmem>>, vector<2x8xf32>
    tpu.vector_store %arg6[%c0_51, %c0_52], %210 {strides = array<i32>} : memref<2x8xf32, #tpu.memory_space<vmem>>, vector<2x8xf32>,
    %c0_53 = arith.constant 0 : index
    %c0_54 = arith.constant 0 : index
    %212 = vector.load %arg2[%c0_53, %c0_54] : memref<1x8xi32, #tpu.memory_space<vmem>>, vector<1x8xi32>
    %213 = tpu.iota {dimensions = array<i32: 0>} : vector<2x8xi32>
    %214 = vector.broadcast %212 : vector<1x8xi32> to vector<2x8xi32>
    %215 = arith.cmpi eq, %213, %214 : vector<2x8xi32>
    %216 = arith.extui %215 : vector<2x8xi1> to vector<2x8xi32>
    %217 = arith.sitofp %216 : vector<2x8xi32> to vector<2x8xf32>
    %218 = math.exp %210 : vector<2x8xf32>
    %cst_55 = arith.constant dense<0.000000e+00> : vector<8xf32>
    %219 = vector.multi_reduction <add>, %218, %cst_55 [0] : vector<2x8xf32> to vector<8xf32>
    %220 = vector.shape_cast %219 : vector<8xf32> to vector<1x8xf32>
    %221 = math.log %220 : vector<1x8xf32>
    %222 = arith.mulf %210, %217 : vector<2x8xf32>
    %cst_56 = arith.constant dense<0.000000e+00> : vector<8xf32>
    %223 = vector.multi_reduction <add>, %222, %cst_56 [0] : vector<2x8xf32> to vector<8xf32>
    %224 = vector.shape_cast %223 : vector<8xf32> to vector<1x8xf32>
    %c8_i32 = arith.constant 8 : i32
    %225 = arith.muli %arg0, %c8_i32 : i32
    %226 = tpu.iota {dimensions = array<i32: 1>} : vector<1x8xi32>
    %227 = vector.broadcast %225 : i32 to vector<1x8xi32>
    %228 = arith.addi %227, %226 : vector<1x8xi32>
    %c8_i32_57 = arith.constant 8 : i32
    %229 = vector.broadcast %c8_i32_57 : i32 to vector<1x8xi32>
    %230 = arith.cmpi slt, %228, %229 : vector<1x8xi32>
    %231 = arith.extui %230 : vector<1x8xi1> to vector<1x8xi32>
    %232 = arith.sitofp %231 : vector<1x8xi32> to vector<1x8xf32>
    %233 = arith.subf %221, %224 : vector<1x8xf32>
    %234 = arith.mulf %233, %232 : vector<1x8xf32>
    %c0_58 = arith.constant 0 : index
    %c0_59 = arith.constant 0 : index
    %235 = vector.load %arg7[%c0_58, %c0_59] : memref<1x8xf32, #tpu.memory_space<vmem>>, vector<1x8xf32>
    tpu.vector_store %arg7[%c0_58, %c0_59], %234 {strides = array<i32>} : memref<1x8xf32, #tpu.memory_space<vmem>>, vector<1x8xf32>,
    return
  }
  func.func @transform_0(%arg0: i32) -> (i32, i32) {
    %c0_i32 = arith.constant 0 : i32
    %c0_i32_0 = arith.constant 0 : i32
    return %arg0, %c0_i32 : i32, i32
  }
  func.func @transform_1(%arg0: i32) -> (i32, i32) {
    %c0_i32 = arith.constant 0 : i32
    %c0_i32_0 = arith.constant 0 : i32
    return %c0_i32, %arg0 : i32, i32
  }
  func.func @transform_2(%arg0: i32) -> (i32, i32) {
    %c0_i32 = arith.constant 0 : i32
    %c0_i32_0 = arith.constant 0 : i32
    %c0_i32_1 = arith.constant 0 : i32
    return %c0_i32, %c0_i32_0 : i32, i32
  }
  func.func @transform_3(%arg0: i32) -> (i32, i32) {
    %c0_i32 = arith.constant 0 : i32
    %c0_i32_0 = arith.constant 0 : i32
    %c0_i32_1 = arith.constant 0 : i32
    return %c0_i32, %c0_i32_0 : i32, i32
  }
  func.func @transform_4(%arg0: i32) -> (i32, i32) {
    %c0_i32 = arith.constant 0 : i32
    %c0_i32_0 = arith.constant 0 : i32
    %c0_i32_1 = arith.constant 0 : i32
    return %c0_i32, %c0_i32_0 : i32, i32
  }
  func.func @transform_5(%arg0: i32) -> (i32, i32) {
    %c0_i32 = arith.constant 0 : i32
    %c0_i32_0 = arith.constant 0 : i32
    return %c0_i32, %arg0 : i32, i32
  }
  func.func @transform_6(%arg0: i32) -> (i32, i32) {
    %c0_i32 = arith.constant 0 : i32
    %c0_i32_0 = arith.constant 0 : i32
    return %c0_i32, %arg0 : i32, i32
  }
}

</mosaic_0001>

<bundles_post_ra>
// kernel: disclf_gender_forward.1
= control target key start
LH: loop header
LB: loop body
LE: loop exit
PB: predicated region body
PF: predicated region fallthrough
CT: control target
= control target key end

     0   :  { %12 = vsyncpa [#allocation3], 0  ;;  %s846_s0 = inlined_call_operand.hbm [shape: f32[8,128], index: 0, kind: input, shape index: {}]   ;;  %s847_s1 = inlined_call_operand.vmem [shape: s32[1,8], index: 1, kind: input, shape index: {}]   ;;  %s848_s2 = inlined_call_operand.hbm [shape: bf16[32,128], index: 2, kind: input, shape index: {}]   ;;  %s849_s3 = inlined_call_operand.hbm [shape: bf16[16,32], index: 3, kind: input, shape index: {}]   ;;  %s850_s4 = inlined_call_operand.hbm [shape: f32[32,128], index: 4, kind: input, shape index: {}]   ;;  %s851_s5 = inlined_call_operand.hbm [shape: f32[2,8], index: 5, kind: output, shape index: {0}]   ;;  %s852_s6 = inlined_call_operand.vmem [shape: f32[1,8], index: 6, kind: output, shape index: {1}]  }
   0x1   :  { %13 = vsyncpa [#allocation6], 0 }
   0x2   :  { %14 = vsyncpa [#allocation9], 0  ;;  %s33_s23 = sshll.u32 %s848_s2, 4  ;;  %s34_s23 = int_to_ptr.hbm [resolvable:$true] %s33_s23 }
   0x3   :  { %15 = vsyncpa [#allocation4], 0  ;;  %s723_s24 = smov [#allocation5]   ;;  %s21_s28 = sshll.u32 %s846_s0, 4  ;;  %s22_s28 = int_to_ptr.hbm [resolvable:$true] %s21_s28 }
   0x4   :  { %s35_s25 = sshll.u32 %s723_s24, 4  ;;  %s724_s29 = smov 64   ;;  %s36_s25 = int_to_ptr.vmem [resolvable:$true] %s35_s25 }
   0x5   :  { %s725_s30 = smov 4   ;;  %s726_s7 = smov [#allocation2]  }
   0x6   :  { %41 = dma.hbm_to_vmem [thread:$0]  %s34_s23, 256, %s36_s25, [#allocation6], %s724_s29, %s724_s29, %s725_s30  }
   0x7   :  { %s23_s8 = sshll.u32 %s726_s7, 4  ;;  %s46_s11 = sshll.u32 %s849_s3, 4  ;;  %s24_s8 = int_to_ptr.vmem [resolvable:$true] %s23_s8  ;;  %s47_s11 = int_to_ptr.hbm [resolvable:$true] %s46_s11 }
   0x8   :  { %26 = dma.hbm_to_vmem [thread:$0]  %s22_s28, 128, %s24_s8, [#allocation3]  }
   0x9   :  { %s59_s13 = sshll.u32 %s850_s4, 4  ;;  %s727_s14 = smov [#allocation7]   ;;  %s60_s13 = int_to_ptr.hbm [resolvable:$true] %s59_s13 }
   0xa   :  { %s48_s15 = sshll.u32 %s727_s14, 4  ;;  %s728_s0 = smov [#allocation8]   ;;  %s49_s15 = int_to_ptr.vmem [resolvable:$true] %s48_s15 }
   0xb   :  { %54 = dma.hbm_to_vmem [thread:$0]  %s47_s11, 128, %s49_s15, [#allocation6], %s724_s29, %s724_s29, %s725_s30  }
   0xc   :  { %s61_s16 = sshll.u32 %s728_s0, 4  ;;  %s729_s17 = smov 128   ;;  %s62_s16 = int_to_ptr.vmem [resolvable:$true] %s61_s16 }
   0xd   :  { %s730_s18 = smov 8  }
   0xe   :  { %67 = dma.hbm_to_vmem [thread:$0]  %s60_s13, 512, %s62_s16, [#allocation9], %s729_s17, %s729_s17, %s730_s18  }
   0xf   :  { %715 = dma.done.wait [#allocation3], 128  }
  0x10   :  { %716 = vsyncadd [#allocation3], 4294967168 }
  0x11   :  { %717 = dma.done.wait [#allocation6], 384  }
  0x12   :  { %718 = vsyncadd [#allocation6], 4294966912 }
  0x13   :  { %719 = dma.done.wait [#allocation9], 512  }
  0x14   :  { %720 = vsyncadd [#allocation9], 4294966784  ;;  %v731_v0 = vmov 26   ;;  %v85_v1 = vld [vmem:[#allocation2] sm:$0xff]  ;;  %v93_v3 = vld [vmem:[#allocation8 + $0x10] sm:$0xff]  ;;  %v732_v9 = vmov 2  }
  0x15   :  { %552 = vset.pattern.permute.xlu0 %v731_v0  ;;  %553 = vset.pattern.permute.xlu1 %v731_v0  ;;  %v86_v2 = vpack.c.bf16 %v85_v1, %v85_v1  ;;  %v811_v4 = vld [vmem:[#allocation8] sm:$0xff]  ;;  %v507_v5 = vld [vmem:[#allocation5] sm:$0xff]  ;;  %v508_v6 = vld [vmem:[#allocation5 + $0x8] sm:$0xff]  ;;  %v733_v10 = vmov 27   ;;  %v734_v11 = vmov 4   ;;  %v735_v12 = vmov 0  }
  0x16   :  { %107 = vperm.xlu0 %552, %v93_v3   ;;  %97 = vperm.xlu1 %553, %v811_v4   ;;  %v94_v7 = vld [vmem:[#allocation8 + $0x18] sm:$0xff]  ;;  %v92_v8 = vld [vmem:[#allocation8 + $0x8] sm:$0xff]  ;;  %v736_v13 = vmov 6   ;;  %v737_v14 = vmov 1   ;;  %v738_v15 = vmov 3   ;;  %v739_v16 = vmov 8  }
  0x17   :  { %134 = vmatpush.bf16.xpose.msra.mxu0 %v86_v2  ;;  %510 = vmatpush.bf16.xpose.msra.mxu2 %v86_v2  ;;  %v740_v20 = vmov 5   ;;  %v741_v22 = vmov 11   ;;  %v742_v28 = vmov 10   ;;  %v743_v31 = vmov 7   ;;  %v509_v46 = vld [vmem:[#allocation7] sm:$0xff]  ;;  %s762_s19 = smov [#allocation10]  }
  0x18   :  { %554 = vset.pattern.permute.xlu2 %v733_v10  ;;  %v744_v37 = vmov 13   ;;  %v745_v43 = vmov 15   ;;  %v746_v44 = vmov 9   ;;  %vm179_vm4 = vcmask 261120   ;;  %v325_v48 = vld [vmem:[#allocation8] sm:$0x3] }
  0x19   :  { %166 = vperm.xlu2 %554, %v811_v4   ;;  %v747_v47 = vmov 28   ;;  %v748_v49 = vmov 19   ;;  %v749_v50 = vmov 12   ;;  %v750_v51 = vmov 17   ;;  %s474_s20 = sshll.u32 %s762_s19, 4  ;;  %s476_s23 = sshll.u32 %s851_s5, 4  ;;  %s475_s20 = int_to_ptr.vmem [resolvable:$true] %s474_s20  ;;  %s477_s23 = int_to_ptr.hbm [resolvable:$true] %s476_s23 }
  0x1a   :  { %v751_v52 = vmov 29   ;;  %v752_v53 = vmov 14   ;;  %v753_v54 = vmov 20   ;;  %v754_v55 = vmov 30  }
  0x1b   :  { %v755_v56 = vmov 16   ;;  %v756_v57 = vmov 22   ;;  %v757_v58 = vmov 18   ;;  %v758_v59 = vmov 24  }
  0x1c   :  { %v759_v60 = vmov 21   ;;  %v760_v61 = vmov 23   ;;  %v761_v62 = vmov 25   ;;  %vm410_vm9 = vcmask 58368  }
  0x1d   :  { %vm467_vm12 = vcmask 57344  }
  0x1e   :  { %135 = vmatmul.bf16.vlgmr.msra.gmra.mxu0 %v507_v5  ;;  %140 = vmatmul.bf16.vlgmr.msra.gmra.mxu2 %v508_v6 }
  0x1f   :  { %112 = vperm.xlu0 %552, %v94_v7   ;;  %102 = vperm.xlu1 %553, %v92_v8  }
  0x21   :  { %555 = vset.pattern.permute.xlu2 %v735_v12 }
  0x22   :  { %206 = vperm.xlu2 %555, %v811_v4  }
  0x27   :  { %557 = vset.pattern.permute.xlu1 %v732_v9  ;;  %556 = vset.pattern.permute.xlu0 %v737_v14 }
  0x28   :  { %220 = vperm.xlu1 %557, %v811_v4   ;;  %213 = vperm.xlu0 %556, %v811_v4  }
  0x2a   :  { %558 = vset.pattern.permute.xlu2 %v738_v15 }
  0x2b   :  { %227 = vperm.xlu2 %558, %v811_v4  }
  0x30   :  { %559 = vset.pattern.permute.xlu1 %v734_v11  ;;  %561 = vset.pattern.permute.xlu0 %v740_v20 }
  0x31   :  { %234 = vperm.xlu1 %559, %v811_v4   ;;  %241 = vperm.xlu0 %561, %v811_v4  }
  0x33   :  { %560 = vset.pattern.permute.xlu2 %v733_v10 }
  0x34   :  { %171 = vperm.xlu2 %560, %v92_v8  }
  0x39   :  { %562 = vset.pattern.permute.xlu1 %v736_v13  ;;  %566 = vset.pattern.permute.xlu0 %v742_v28 }
  0x3a   :  { %248 = vperm.xlu1 %562, %v811_v4   ;;  %276 = vperm.xlu0 %566, %v811_v4  }
  0x3c   :  { %563 = vset.pattern.permute.xlu2 %v743_v31 }
  0x3d   :  { %255 = vperm.xlu2 %563, %v811_v4  }
  0x42   :  { %564 = vset.pattern.permute.xlu1 %v739_v16  ;;  %571 = vset.pattern.permute.xlu0 %v745_v43 }
  0x43   :  { %262 = vperm.xlu1 %564, %v811_v4   ;;  %311 = vperm.xlu0 %571, %v811_v4  }
  0x45   :  { %565 = vset.pattern.permute.xlu2 %v746_v44 }
  0x46   :  { %269 = vperm.xlu2 %565, %v811_v4  }
  0x4b   :  { %567 = vset.pattern.permute.xlu1 %v741_v22  ;;  %576 = vset.pattern.permute.xlu0 %v748_v49 }
  0x4c   :  { %283 = vperm.xlu1 %567, %v811_v4   ;;  %349 = vperm.xlu0 %576, %v325_v48  }
  0x4e   :  { %568 = vset.pattern.permute.xlu2 %v749_v50 }
  0x4f   :  { %290 = vperm.xlu2 %568, %v811_v4  }
  0x54   :  { %569 = vset.pattern.permute.xlu1 %v744_v37  ;;  %581 = vset.pattern.permute.xlu0 %v751_v52 }
  0x55   :  { %297 = vperm.xlu1 %569, %v811_v4   ;;  %384 = vperm.xlu0 %581, %v325_v48  }
  0x57   :  { %570 = vset.pattern.permute.xlu2 %v752_v53 }
  0x58   :  { %304 = vperm.xlu2 %570, %v811_v4  }
  0x5d   :  { %572 = vset.pattern.permute.xlu1 %v747_v47  ;;  %585 = vset.pattern.permute.xlu0 %v754_v55 }
  0x5e   :  { %318 = vperm.xlu1 %572, %v811_v4  }
  0x60   :  { %573 = vset.pattern.permute.xlu2 %v755_v56 }
  0x61   :  { %328 = vperm.xlu2 %573, %v325_v48  }
  0x66   :  { %574 = vset.pattern.permute.xlu1 %v750_v51 }
  0x67   :  { %335 = vperm.xlu1 %574, %v325_v48  }
  0x69   :  { %575 = vset.pattern.permute.xlu2 %v757_v58 }
  0x6a   :  { %342 = vperm.xlu2 %575, %v325_v48  }
  0x6f   :  { %577 = vset.pattern.permute.xlu1 %v753_v54 }
  0x70   :  { %356 = vperm.xlu1 %577, %v325_v48  }
  0x72   :  { %578 = vset.pattern.permute.xlu2 %v759_v60 }
  0x73   :  { %363 = vperm.xlu2 %578, %v325_v48   ;;  %v167_v63 = vpop.permute.xlu2 %166 }
  0x78   :  { %579 = vset.pattern.permute.xlu1 %v756_v57 }
  0x79   :  { %370 = vperm.xlu1 %579, %v325_v48  }
  0x7b   :  { %580 = vset.pattern.permute.xlu2 %v760_v61 }
  0x7c   :  { %377 = vperm.xlu2 %580, %v325_v48   ;;  %v207_v0 = vpop.permute.xlu2 %206 }
  0x81   :  { %582 = vset.pattern.permute.xlu1 %v758_v59 }
  0x82   :  { %392 = vperm.xlu1 %582, %v325_v48  }
  0x84   :  { %583 = vset.pattern.permute.xlu2 %v761_v62 }
  0x85   :  { %399 = vperm.xlu2 %583, %v325_v48   ;;  %v228_v2 = vpop.permute.xlu2 %227 }
  0x88   :  { %v98_v17 = vpop.permute.xlu1 %97  ;;  %v108_v19 = vpop.permute.xlu0 %107 }
  0x8a   :  { %584 = vset.pattern.permute.xlu1 %v754_v55 }
  0x8b   :  { %406 = vperm.xlu1 %584, %v325_v48  }
  0x8e   :  { %v172_v4 = vpop.permute.xlu2 %171 }
  0x91   :  { %v103_v23 = vpop.permute.xlu1 %102  ;;  %v113_v29 = vpop.permute.xlu0 %112 }
  0x97   :  { %v256_v6 = vpop.permute.xlu2 %255 }
  0x9a   :  { %v221_v1 = vpop.permute.xlu1 %220  ;;  %v214_v11 = vpop.permute.xlu0 %213 }
  0x9b   :  { %v136_v18 = vpop.f32.mrf.mxu0 }
  0x9c   :  { %v137_v26 = vadd.f32 %v136_v18, %v98_v17 }
  0x9e   :  { %v150_v34 = vmul.f32 0.2, %v137_v26  ;;  %vm146_vm2 = vcmp.gt.f32.partialorder %v137_v26, 0.0 }
  0xa0   :  { %v154_v41 = vsel %vm146_vm2, %v137_v26, %v150_v34  ;;  %v270_v8 = vpop.permute.xlu2 %269 }
  0xa1   :  { %v141_v21 = vpop.f32.mrf.mxu2 }
  0xa2   :  { %v142_v25 = vadd.f32 %v141_v21, %v108_v19 }
  0xa3   :  { %v138_v24 = vpop.f32.mrf.mxu0  ;;  %v235_v3 = vpop.permute.xlu1 %234 }
  0xa4   :  { %v139_v27 = vadd.f32 %v138_v24, %v103_v23  ;;  %v152_v32 = vmul.f32 0.2, %v142_v25  ;;  %vm148_vm0 = vcmp.gt.f32.partialorder %v142_v25, 0.0  ;;  %v242_v31 = vpop.permute.xlu0 %241 }
  0xa6   :  { %v151_v35 = vmul.f32 0.2, %v139_v27  ;;  %vm147_vm3 = vcmp.gt.f32.partialorder %v139_v27, 0.0  ;;  %v156_v38 = vsel %vm148_vm0, %v142_v25, %v152_v32 }
  0xa8   :  { %v155_v42 = vsel %vm147_vm3, %v139_v27, %v151_v35 }
  0xa9   :  { %v143_v30 = vpop.f32.mrf.mxu2  ;;  %v160_v45 = vpack.c.bf16 %v155_v42, %v154_v41  ;;  %v291_v18 = vpop.permute.xlu2 %290 }
  0xaa   :  { %v144_v33 = vadd.f32 %v143_v30, %v113_v29 }
  0xac   :  { %v153_v36 = vmul.f32 0.2, %v144_v33  ;;  %vm149_vm1 = vcmp.gt.f32.partialorder %v144_v33, 0.0  ;;  %v249_v5 = vpop.permute.xlu1 %248  ;;  %v277_v50 = vpop.permute.xlu0 %276 }
  0xae   :  { %v157_v39 = vsel %vm149_vm1, %v144_v33, %v153_v36 }
  0xaf   :  { %v161_v40 = vpack.c.bf16 %v157_v39, %v156_v38 }
  0xb1   :  { %189 = vmatpush.bf16.msra.mxu1 %v161_v40 }
  0xb2   :  { %v305_v37 = vpop.permute.xlu2 %304 }
  0xb5   :  { %190 = vmatpush.bf16.msra.mxu1 %v160_v45  ;;  %v263_v7 = vpop.permute.xlu1 %262 }
  0xb8   :  { %504 = vmatmul.msk.bf16.vlgmr.msra.gmra.mxu1 %vm179_vm4, %v509_v46 }
  0xbb   :  { %v329_v58 = vpop.permute.xlu2 %328 }
  0xbe   :  { %v284_v13 = vpop.permute.xlu1 %283 }
  0xc7   :  { %v298_v32 = vpop.permute.xlu1 %297 }
  0xd0   :  { %v319_v51 = vpop.permute.xlu1 %318 }
 0x135   :  { %v192_v9 = vpop.f32.mrf.mxu1 }
 0x136   :  { %v193_v10 = vadd.f32 %v192_v9, %v167_v63 }
 0x138   :  { %vm197_vm5 = vcmp.gt.f32.partialorder %v193_v10, 0.0  ;;  %v199_v12 = vmul.f32 0.2, %v193_v10 }
 0x13a   :  { %v201_v14 = vsel %vm197_vm5, %v193_v10, %v199_v12  ;;  %v343_v10 = vpop.permute.xlu2 %342 }
 0x13b   :  { %v209_v15 = vperm.slane %v201_v14, 0  ;;  %v216_v16 = vperm.slane %v201_v14, 1  ;;  %v223_v17 = vperm.slane %v201_v14, 2  ;;  %v230_v21 = vperm.slane %v201_v14, 3 }
 0x13c   :  { %v237_v26 = vperm.slane %v201_v14, 4  ;;  %v244_v29 = vperm.slane %v201_v14, 5  ;;  %v251_v35 = vperm.slane %v201_v14, 6  ;;  %v258_v40 = vperm.slane %v201_v14, 7 }
 0x13d   :  { %v210_v19 = vmul.f32 %v209_v15, %v207_v0  ;;  %v217_v20 = vmul.f32 %v216_v16, %v214_v11  ;;  %v194_v22 = vpop.f32.mrf.mxu1  ;;  %v224_v25 = vmul.f32 %v223_v17, %v221_v1  ;;  %v231_v28 = vmul.f32 %v230_v21, %v228_v2 }
 0x13e   :  { %v195_v23 = vadd.f32 %v194_v22, %v172_v4  ;;  %v238_v34 = vmul.f32 %v237_v26, %v235_v3  ;;  %v245_v39 = vmul.f32 %v244_v29, %v242_v31  ;;  %v252_v42 = vmul.f32 %v251_v35, %v249_v5  ;;  %v312_v4 = vpop.permute.xlu0 %311  ;;  %v336_v5 = vpop.permute.xlu1 %335 }
 0x13f   :  { %v218_v24 = vadd.f32 %v217_v20, %v210_v19  ;;  %v259_v45 = vmul.f32 %v258_v40, %v256_v6 }
 0x140   :  { %v200_v27 = vmul.f32 0.2, %v195_v23  ;;  %vm198_vm6 = vcmp.gt.f32.partialorder %v195_v23, 0.0 }
 0x141   :  { %v225_v30 = vadd.f32 %v224_v25, %v218_v24 }
 0x142   :  { %v202_v36 = vsel %vm198_vm6, %v195_v23, %v200_v27 }
 0x143   :  { %v232_v33 = vadd.f32 %v231_v28, %v225_v30  ;;  %v265_v43 = vperm.slane %v202_v36, 0  ;;  %v272_v46 = vperm.slane %v202_v36, 1  ;;  %v279_v49 = vperm.slane %v202_v36, 2 }
 0x144   :  { %v286_v54 = vperm.slane %v202_v36, 3  ;;  %v293_v57 = vperm.slane %v202_v36, 4  ;;  %v300_v61 = vperm.slane %v202_v36, 5  ;;  %v307_v62 = vperm.slane %v202_v36, 6 }
 0x145   :  { %v239_v38 = vadd.f32 %v238_v34, %v232_v33  ;;  %v266_v48 = vmul.f32 %v265_v43, %v263_v7  ;;  %v273_v53 = vmul.f32 %v272_v46, %v270_v8  ;;  %v280_v56 = vmul.f32 %v279_v49, %v277_v50 }
 0x146   :  { %v287_v60 = vmul.f32 %v286_v54, %v284_v13  ;;  %v294_v0 = vmul.f32 %v293_v57, %v291_v18  ;;  %v301_v2 = vmul.f32 %v300_v61, %v298_v32  ;;  %v314_v3 = vperm.slane %v202_v36, 7  ;;  %v357_v15 = vpop.permute.xlu1 %356  ;;  %v364_v18 = vpop.permute.xlu2 %363 }
 0x147   :  { %v246_v41 = vadd.f32 %v245_v39, %v239_v38  ;;  %v308_v6 = vmul.f32 %v307_v62, %v305_v37  ;;  %v350_v23 = vpop.permute.xlu0 %349 }
 0x148   :  { %v315_v9 = vmul.f32 %v314_v3, %v312_v4 }
 0x149   :  { %v253_v44 = vadd.f32 %v252_v42, %v246_v41 }
 0x14b   :  { %v260_v47 = vadd.f32 %v259_v45, %v253_v44 }
 0x14d   :  { %v267_v52 = vadd.f32 %v266_v48, %v260_v47 }
 0x14e   :  { %v371_v32 = vpop.permute.xlu1 %370  ;;  %v378_v37 = vpop.permute.xlu2 %377 }
 0x14f   :  { %v274_v55 = vadd.f32 %v273_v53, %v267_v52  ;;  %v385_v42 = vpop.permute.xlu0 %384 }
 0x151   :  { %v281_v59 = vadd.f32 %v280_v56, %v274_v55 }
 0x153   :  { %v288_v63 = vadd.f32 %v287_v60, %v281_v59 }
 0x155   :  { %v295_v1 = vadd.f32 %v294_v0, %v288_v63 }
 0x156   :  { %v393_v44 = vpop.permute.xlu1 %392  ;;  %v400_v48 = vpop.permute.xlu2 %399 }
 0x157   :  { %v302_v7 = vadd.f32 %v301_v2, %v295_v1 }
 0x159   :  { %v309_v8 = vadd.f32 %v308_v6, %v302_v7 }
 0x15b   :  { %v316_v11 = vadd.f32 %v315_v9, %v309_v8  ;;  %v432_v9 = vlaneseq }
 0x15d   :  { %v321_v12 = vadd.f32 %v319_v51, %v316_v11  ;;  %v586_v11 = vld [vmem:[%s847_s1] ss:$0 sm:$0xff] }
 0x15e   :  { %v407_v53 = vpop.permute.xlu1 %406 }
 0x15f   :  { %vm322_vm7 = vcmp.gt.f32.partialorder %v321_v12, 0.0  ;;  %v323_v14 = vmul.f32 0.2, %v321_v12 }
 0x161   :  { %v324_v13 = vsel %vm322_vm7, %v321_v12, %v323_v14 }
 0x162   :  { %v345_v16 = vperm.slane %v324_v13, 2  ;;  %v331_v17 = vperm.slane %v324_v13, 0  ;;  %v338_v19 = vperm.slane %v324_v13, 1  ;;  %v352_v22 = vperm.slane %v324_v13, 3 }
 0x163   :  { %v359_v26 = vperm.slane %v324_v13, 4  ;;  %v366_v27 = vperm.slane %v324_v13, 5  ;;  %v373_v33 = vperm.slane %v324_v13, 6  ;;  %v380_v35 = vperm.slane %v324_v13, 7 }
 0x164   :  { %v332_v20 = vmul.f32 %v331_v17, %v329_v58  ;;  %v339_v21 = vmul.f32 %v338_v19, %v336_v5  ;;  %v346_v24 = vmul.f32 %v345_v16, %v343_v10  ;;  %v353_v29 = vmul.f32 %v352_v22, %v350_v23 }
 0x165   :  { %v360_v30 = vmul.f32 %v359_v26, %v357_v15  ;;  %v367_v34 = vmul.f32 %v366_v27, %v364_v18  ;;  %v374_v39 = vmul.f32 %v373_v33, %v371_v32  ;;  %v381_v40 = vmul.f32 %v380_v35, %v378_v37 }
 0x166   :  { %v340_v25 = vadd.f32 %v339_v21, %v332_v20  ;;  %v433_v10 = vshrl.u32 %v432_v9, 7  ;;  %v763_v15 = vmov 0.0  }
 0x168   :  { %v347_v28 = vadd.f32 %v346_v24, %v340_v25  ;;  %vm435_vm10 = vcmp.eq.s32.totalorder %v433_v10, %v586_v11 }
 0x169   :  { %v505_v13 = vsel %vm435_vm10, 1.0, %v763_v15 }
 0x16a   :  { %v354_v31 = vadd.f32 %v353_v29, %v347_v28 }
 0x16c   :  { %v361_v36 = vadd.f32 %v360_v30, %v354_v31  ;;  %v459_v31 = vand.u32 127, %v432_v9 }
 0x16e   :  { %v368_v38 = vadd.f32 %v367_v34, %v361_v36  ;;  %vm462_vm11 = vcmp.lt.s32.totalorder %v459_v31, 8 }
 0x16f   :  { %v506_v36 = vsel %vm462_vm11, 1.0, %v763_v15 }
 0x170   :  { %v375_v41 = vadd.f32 %v374_v39, %v368_v38 }
 0x172   :  { %v382_v43 = vadd.f32 %v381_v40, %v375_v41 }
 0x174   :  { %v387_v45 = vadd.f32 %v385_v42, %v382_v43 }
 0x176   :  { %vm388_vm8 = vcmp.gt.f32.partialorder %v387_v45, 0.0  ;;  %v389_v46 = vmul.f32 0.2, %v387_v45 }
 0x178   :  { %v390_v47 = vsel %vm388_vm8, %v387_v45, %v389_v46 }
 0x179   :  { %v395_v49 = vperm.slane %v390_v47, 0  ;;  %v402_v50 = vperm.slane %v390_v47, 1 }
 0x17b   :  { %v396_v51 = vmul.f32 %v395_v49, %v393_v44  ;;  %v403_v52 = vmul.f32 %v402_v50, %v400_v48 }
 0x17d   :  { %v404_v54 = vadd.f32 %v403_v52, %v396_v51 }
 0x17f   :  { %v409_v55 = vadd.f32 %v407_v53, %v404_v54 }
 0x181   :  { %v411_v56 = vsel %vm410_vm9, %v409_v55, -inf }
 0x182   :  { %v412_v57 = vrot.slane %v411_v56, 4 }
 0x184   :  { %v413_v58 = vmax.f32 %v411_v56, %v412_v57 }
 0x186   :  { %v414_v59 = vrot.slane %v413_v58, 2 }
 0x188   :  { %v415_v60 = vmax.f32 %v413_v58, %v414_v59 }
 0x18a   :  { %v416_v61 = vrot.slane %v415_v60, 1 }
 0x18c   :  { %v417_v62 = vmax.f32 %v415_v60, %v416_v61 }
 0x18e   :  { %v418_v63 = vsub.f32 %v409_v55, %v417_v62 }
 0x190   :  { %v419_v0 = vmul.f32 1.442695, %v418_v63 }
 0x192   :  { %587 = vpow2.f32 %v419_v0 }
 0x198   :  { %v588_v1 = vpop.eup %587 }
 0x199   :  { %v421_v2 = vsel %vm410_vm9, %v588_v1, 0.0 }
 0x19a   :  { %v422_v3 = vrot.slane %v421_v2, 4 }
 0x19c   :  { %v423_v4 = vadd.f32 %v422_v3, %v421_v2 }
 0x19e   :  { %v424_v5 = vrot.slane %v423_v4, 2 }
 0x1a0   :  { %v425_v6 = vadd.f32 %v424_v5, %v423_v4 }
 0x1a2   :  { %v426_v7 = vrot.slane %v425_v6, 1 }
 0x1a4   :  { %v427_v8 = vadd.f32 %v426_v7, %v425_v6 }
 0x1a6   :  { %589 = vrcp.f32 %v427_v8 }
 0x1ac   :  { %v590_v12 = vpop.eup %589 }
 0x1ad   :  { %v429_v14 = vmul.f32 %v590_v12, %v588_v1 }
 0x1af   :  { %430 = vst.msk [vmem:[#allocation10] sm:$0x3] %vm410_vm9, %v429_v14  ;;  %v438_v16 = vmul.f32 1.442695, %v429_v14  ;;  %v449_v17 = vmul.f32 %v505_v13, %v429_v14 }
 0x1b0   :  { %479 = dma.vmem_to_hbm [thread:$0]  %s475_s20, 32, %s477_s23, [#allocation4]  }
 0x1b1   :  { %591 = vpow2.f32 %v438_v16  ;;  %v450_v19 = vsel %vm410_vm9, %v449_v17, 0.0 }
 0x1b2   :  { %v451_v21 = vrot.slane %v450_v19, 4 }
 0x1b4   :  { %v452_v24 = vadd.f32 %v451_v21, %v450_v19 }
 0x1b6   :  { %v453_v27 = vrot.slane %v452_v24, 2 }
 0x1b7   :  { %v592_v18 = vpop.eup %591 }
 0x1b8   :  { %v440_v20 = vsel %vm410_vm9, %v592_v18, 0.0  ;;  %v454_v30 = vadd.f32 %v453_v27, %v452_v24 }
 0x1b9   :  { %v441_v22 = vrot.slane %v440_v20, 4 }
 0x1ba   :  { %v455_v32 = vrot.slane %v454_v30, 1 }
 0x1bb   :  { %v442_v23 = vadd.f32 %v441_v22, %v440_v20 }
 0x1bc   :  { %v456_v35 = vadd.f32 %v455_v32, %v454_v30 }
 0x1bd   :  { %v443_v25 = vrot.slane %v442_v23, 2 }
 0x1bf   :  { %v444_v26 = vadd.f32 %v443_v25, %v442_v23 }
 0x1c1   :  { %v445_v28 = vrot.slane %v444_v26, 1 }
 0x1c3   :  { %v446_v29 = vadd.f32 %v445_v28, %v444_v26 }
 0x1c5   :  { %593 = vlog2.f32 %v446_v29 }
 0x1cb   :  { %v594_v33 = vpop.eup %593 }
 0x1cc   :  { %v448_v34 = vmul.f32 0.6931472, %v594_v33 }
 0x1ce   :  { %v465_v37 = vsub.f32 %v448_v34, %v456_v35 }
 0x1d0   :  { %v466_v38 = vmul.f32 %v506_v36, %v465_v37 }
 0x1d2   :  { %468 = vst.msk [vmem:[%s852_s6] sm:$0x1] %vm467_vm12, %v466_v38 }
 0x1d3   :  { %721 = dma.done.wait [#allocation4], 32  }
 0x1d4   :  { %722 = vsyncadd [#allocation4], 4294967264 }
 0x1d5   :  { %488 = vsyncpa [#allocation3], 1 }
 0x1d6   :  { %489 = vsyncpa [#allocation6], 1 }
 0x1d7   :  { %490 = vsyncpa [#allocation9], 1 }
 0x1d8   :  { %491 = vsyncpa [#allocation4], 1 }

</bundles_post_ra>
